<compile_context>
chip_gen: v6e
topology: v6e:2x2x1
jax: 0.10.0
libtpu: 0.0.40
codegen_flags: <defaults>
</compile_context>

<pallas_src>
import functools

import jax
import jax.numpy as jnp
from jax.experimental import pallas as pl
from jax.experimental.pallas import tpu as pltpu


def _round_up(x, m):
    return -(-x // m) * m


def concat_combine_kernel(h_ref, f_ref,
                          we_ref, be_ref,
                          w1h_ref, w1f_ref, b1_ref,
                          w2_ref, b2_ref,
                          o_ref):
    # Enricher: Linear(F, F) + ReLU   (f32 accumulate, bias/ReLU in f32)
    feats = jnp.dot(f_ref[...], we_ref[...],
                    preferred_element_type=jnp.float32) + be_ref[...]
    feats = jnp.maximum(feats, 0.0)

    # Layer 1: concat(hidden, enriched_features) @ W1 + b1, split-matmul form.
    z1 = (jnp.dot(h_ref[...], w1h_ref[...], preferred_element_type=jnp.float32)
          + jnp.dot(feats.astype(w1f_ref.dtype), w1f_ref[...],
                    preferred_element_type=jnp.float32)
          + b1_ref[...])
    z1 = jnp.maximum(z1, 0.0)  # activation=True

    # Layer 2: Linear(waist, out_size)  (padded out columns are exact zeros)
    out = jnp.dot(z1.astype(w2_ref.dtype), w2_ref[...],
                  preferred_element_type=jnp.float32) + b2_ref[...]
    o_ref[...] = out.astype(o_ref.dtype)


def _default_vmem_limit_bytes():
    """Generation-aware scoped-VMEM request (~75% of capacity, capped at 100 MiB)."""
    try:
        cap = int(pltpu.get_tpu_info().vmem_capacity_bytes)
        return min((cap * 3) // 4, 100 * 1024 * 1024)
    except Exception:
        # Conservative: fits under v7x's 64 MiB per-TC VMEM, above v5e/v6e defaults.
        return 48 * 1024 * 1024


def _derive_tile_n(N, H, F, waist_p, out_p, vmem_limit_bytes, *,
                   max_tile_n=1024, weight_buffers=2):
    bf16, f32 = 2, 4
    resident_weight_bytes = weight_buffers * (
        bf16 * (F * F + H * waist_p + F * waist_p + waist_p * out_p)
        + f32 * (F + waist_p + out_p))
    # Headroom for compiler-internal scratch / semaphores.
    avail = max(vmem_limit_bytes - resident_weight_bytes - (4 << 20), 1 << 20)
    bytes_per_row = (
        2 * bf16 * (H + F)               # double-buffered bf16 input row tiles
        + 2 * bf16 * out_p               # double-buffered bf16 output row tile
        + f32 * (F + waist_p + out_p))   # f32 temporaries: feats, z1, out
    tile_n = int(avail // bytes_per_row)
    tile_n = max(16, min(max_tile_n, tile_n))
    tile_n = (tile_n // 16) * 16         # bf16 packs 2 rows/sublane -> 16-row granularity
    if N >= 32:
        # Keep >= 2 row tiles so the "parallel" axis feeds both v7x TensorCores.
        tile_n = min(tile_n, max(16, ((N // 2) // 16) * 16))
    tile_n = min(tile_n, _round_up(N, 16))  # don't over-tile tiny N
    return tile_n


def concat_combine_forward(hidden, features, params, *,
                           max_tile_n=1024, vmem_limit_bytes=None):
    """hidden: [B, S, H], features: [B, S, F] -> [B, S, out_size] (bf16)."""
    B, S, H = hidden.shape
    F = features.shape[-1]
    waist_p = params["b1"].shape[-1]     # padded waist (multiple of 128)
    out_p = params["b2"].shape[-1]       # padded out   (multiple of 128, lane-dense)
    out_size = params["out_size"]
    N = B * S

    io_dtype = params["We"].dtype        # bf16 weights -> bf16 activations on the wire
    h2d = hidden.reshape(N, H)
    f2d = features.reshape(N, F)
    if h2d.dtype != io_dtype:
        # TODO(synk): fuse this cast into the producer to avoid an extra HBM pass.
        h2d = h2d.astype(io_dtype)
    if f2d.dtype != io_dtype:
        f2d = f2d.astype(io_dtype)

    if vmem_limit_bytes is None:
        vmem_limit_bytes = _default_vmem_limit_bytes()

    weight_bytes_1x = (2 * (F * F + H * waist_p + F * waist_p + waist_p * out_p)
                       + 4 * (F + waist_p + out_p))
    cost = pl.CostEstimate(
        flops=2 * N * (F * F + H * waist_p + F * waist_p + waist_p * out_p),
        transcendentals=0,
        bytes_accessed=N * (H + F) * 2 + N * out_p * 2 + weight_bytes_1x,
    )

    def _run(single_buffer_weights):
        wbuf = 1 if single_buffer_weights else 2
        tile_n = _derive_tile_n(N, H, F, waist_p, out_p, vmem_limit_bytes,
                                max_tile_n=max_tile_n, weight_buffers=wbuf)
        grid = ((N + tile_n - 1) // tile_n,)   # ragged last block handled by Pallas

        wkw = {"pipeline_mode": pl.Buffered(1)} if single_buffer_weights else {}

        def _full(shape):
            # Whole array resident in VMEM, same block every grid step (no re-DMA).
            return pl.BlockSpec(shape, lambda i: (0,) * len(shape), **wkw)

        in_specs = [
            pl.BlockSpec((tile_n, H), lambda i: (i, 0)),   # hidden row tile
            pl.BlockSpec((tile_n, F), lambda i: (i, 0)),   # features row tile
            _full((F, F)),                                 # We
            _full((1, F)),                                 # be
            _full((H, waist_p)),                           # W1h
            _full((F, waist_p)),                           # W1f
            _full((1, waist_p)),                           # b1
            _full((waist_p, out_p)),                       # W2
            _full((1, out_p)),                             # b2
        ]
        out_specs = pl.BlockSpec((tile_n, out_p), lambda i: (i, 0))

        return pl.pallas_call(
            concat_combine_kernel,
            out_shape=jax.ShapeDtypeStruct((N, out_p), io_dtype),
            grid=grid,
            in_specs=in_specs,
            out_specs=out_specs,
            compiler_params=pltpu.CompilerParams(
                dimension_semantics=("parallel",),   # shard row tiles on v7x's 2 TCs
                vmem_limit_bytes=vmem_limit_bytes,
            ),
            cost_estimate=cost,
        )(h2d, f2d,
          params["We"], params["be"],
          params["W1h"], params["W1f"], params["b1"],
          params["W2"], params["b2"])

    try:
        out2d = _run(True)
    except Exception:
        # TODO(synk): pl.Buffered(1) on constant-index weight specs unsupported by
        # this JAX build; fall back to default double-buffered weight blocks.
        out2d = _run(False)

    # Column slice drops the exact-zero padded output lanes; reshape is free.
    return out2d[:, :out_size].reshape(B, S, out_size)


def init_params(key, hidden_size, feature_size, out_size, small=False,
                param_dtype=jnp.bfloat16):
    waist = (min(hidden_size, feature_size) if small
             else max(hidden_size, feature_size))
    # Zero-pad the matmul N dims (waist, out) to lane multiples (128):
    #  * out_p makes the HBM output store lane-dense (no masked vst.msk),
    #  * padding is exact (zero weights/biases) and sliced off in the wrapper.
    waist_p = _round_up(waist, 128)
    out_p = _round_up(out_size, 128)

    ks = jax.random.split(key, 6)
    scale = 0.05
    We = scale * jax.random.normal(ks[0], (feature_size, feature_size), jnp.float32)
    be = scale * jax.random.normal(ks[1], (1, feature_size), jnp.float32)
    W1 = scale * jax.random.normal(ks[2], (hidden_size + feature_size, waist),
                                   jnp.float32)
    b1 = scale * jax.random.normal(ks[3], (1, waist), jnp.float32)
    W2 = scale * jax.random.normal(ks[4], (waist, out_size), jnp.float32)
    b2 = scale * jax.random.normal(ks[5], (1, out_size), jnp.float32)

    W1p = jnp.pad(W1, ((0, 0), (0, waist_p - waist)))
    b1p = jnp.pad(b1, ((0, 0), (0, waist_p - waist)))
    W2p = jnp.pad(W2, ((0, waist_p - waist), (0, out_p - out_size)))
    b2p = jnp.pad(b2, ((0, 0), (0, out_p - out_size)))

    return {
        # Matmul operands in bf16 (MXU-friendly, half the HBM/VMEM bytes).
        "We": We.astype(param_dtype),
        "W1h": W1p[:hidden_size, :].astype(param_dtype),
        "W1f": W1p[hidden_size:, :].astype(param_dtype),
        "W2": W2p.astype(param_dtype),
        # Biases stay f32: added directly to the f32 accumulators.
        "be": be, "b1": b1p, "b2": b2p,
        "out_size": out_size,
    }


def reference_forward(hidden, features, params):
    """Pure-JAX f32 reference mirroring the PyTorch module (eval mode)."""
    h = hidden.astype(jnp.float32)
    f = features.astype(jnp.float32)
    We = params["We"].astype(jnp.float32)
    W1 = jnp.concatenate([params["W1h"], params["W1f"]], axis=0).astype(jnp.float32)
    W2 = params["W2"].astype(jnp.float32)
    f = jnp.maximum(f @ We + params["be"][0], 0.0)
    x = jnp.concatenate([h, f], axis=-1)
    x = jnp.maximum(x @ W1 + params["b1"][0], 0.0)
    out = x @ W2 + params["b2"][0]
    return out[..., :params["out_size"]]   # drop exact-zero padded output columns


if __name__ == "__main__":
    B, S = 2, 8
    hidden_size, feature_size, out_size = 32, 16, 8

    key = jax.random.PRNGKey(0)
    k_h, k_f, k_p = jax.random.split(key, 3)
    # Canonical inputs live in bf16 (no f32 up-cast round-trip in the wrapper).
    hidden = jax.random.normal(k_h, (B, S, hidden_size), jnp.float32).astype(jnp.bfloat16)
    features = jax.random.normal(k_f, (B, S, feature_size), jnp.float32).astype(jnp.bfloat16)
    params = init_params(k_p, hidden_size, feature_size, out_size)

    fwd = functools.partial(concat_combine_forward, params=params)
    out = fwd(hidden, features)
    out = jax.block_until_ready(out)

    ref = reference_forward(hidden, features, params)
    assert out.shape == (B, S, out_size)
    assert jnp.allclose(out.astype(jnp.float32), ref, atol=2e-2, rtol=2e-2)

    print("KERNEL_OK")
</pallas_src>

<mosaic_0001>
module attributes {stable_mosaic.version = 11 : i64} {
  func.func @concat_combine_kernel(%arg0: i32, %arg1: memref<16x32xbf16, #tpu.memory_space<vmem>>, %arg2: memref<16x16xbf16, #tpu.memory_space<vmem>>, %arg3: memref<16x16xbf16, #tpu.memory_space<vmem>>, %arg4: memref<1x16xf32, #tpu.memory_space<vmem>>, %arg5: memref<32x128xbf16, #tpu.memory_space<vmem>>, %arg6: memref<16x128xbf16, #tpu.memory_space<vmem>>, %arg7: memref<1x128xf32, #tpu.memory_space<vmem>>, %arg8: memref<128x128xbf16, #tpu.memory_space<vmem>>, %arg9: memref<1x128xf32, #tpu.memory_space<vmem>>, %arg10: memref<16x128xbf16, #tpu.memory_space<vmem>>) attributes {dimension_semantics = [#tpu.dimension_semantics<parallel>], iteration_bounds = array<i64: 1>, scalar_prefetch = 0 : i64, scratch_operands = 0 : i64, tpu.core_type = #tpu.core_type<tc>, window_params = [{transform_indices = @transform_0, window_bounds = array<i64: 16, 32>}, {transform_indices = @transform_1, window_bounds = array<i64: 16, 16>}, {pipeline_mode = #tpu.pipeline_mode<synchronous>, transform_indices = @transform_2, window_bounds = array<i64: 16, 16>}, {pipeline_mode = #tpu.pipeline_mode<synchronous>, transform_indices = @transform_3, window_bounds = array<i64: 1, 16>}, {pipeline_mode = #tpu.pipeline_mode<synchronous>, transform_indices = @transform_4, window_bounds = array<i64: 32, 128>}, {pipeline_mode = #tpu.pipeline_mode<synchronous>, transform_indices = @transform_5, window_bounds = array<i64: 16, 128>}, {pipeline_mode = #tpu.pipeline_mode<synchronous>, transform_indices = @transform_6, window_bounds = array<i64: 1, 128>}, {pipeline_mode = #tpu.pipeline_mode<synchronous>, transform_indices = @transform_7, window_bounds = array<i64: 128, 128>}, {pipeline_mode = #tpu.pipeline_mode<synchronous>, transform_indices = @transform_8, window_bounds = array<i64: 1, 128>}, {transform_indices = @transform_9, window_bounds = array<i64: 16, 128>}]} {
    %c0 = arith.constant 0 : index
    %c0_0 = arith.constant 0 : index
    %0 = vector.load %arg2[%c0, %c0_0] : memref<16x16xbf16, #tpu.memory_space<vmem>>, vector<16x16xbf16>
    %c0_1 = arith.constant 0 : index
    %c0_2 = arith.constant 0 : index
    %1 = vector.load %arg3[%c0_1, %c0_2] : memref<16x16xbf16, #tpu.memory_space<vmem>>, vector<16x16xbf16>
    %cst = arith.constant dense<0.000000e+00> : vector<16x16xf32>
    %2 = tpu.matmul %0, %1, %cst {dimension_numbers = #tpu.dot_dimension_numbers<[1], [0], [0], [1], [0, 0, 1, 1], [], []>} : vector<16x16xbf16>, vector<16x16xbf16>, vector<16x16xf32> -> vector<16x16xf32>
    %c0_3 = arith.constant 0 : index
    %c0_4 = arith.constant 0 : index
    %3 = vector.load %arg4[%c0_3, %c0_4] : memref<1x16xf32, #tpu.memory_space<vmem>>, vector<1x16xf32>
    %4 = vector.broadcast %3 : vector<1x16xf32> to vector<16x16xf32>
    %5 = arith.addf %2, %4 : vector<16x16xf32>
    %cst_5 = arith.constant 0.000000e+00 : f32
    %6 = vector.broadcast %cst_5 : f32 to vector<16x16xf32>
    %7 = arith.maximumf %5, %6 : vector<16x16xf32>
    %c0_6 = arith.constant 0 : index
    %c0_7 = arith.constant 0 : index
    %8 = vector.load %arg1[%c0_6, %c0_7] : memref<16x32xbf16, #tpu.memory_space<vmem>>, vector<16x32xbf16>
    %c0_8 = arith.constant 0 : index
    %c0_9 = arith.constant 0 : index
    %9 = vector.load %arg5[%c0_8, %c0_9] : memref<32x128xbf16, #tpu.memory_space<vmem>>, vector<32x128xbf16>
    %cst_10 = arith.constant dense<0.000000e+00> : vector<16x128xf32>
    %10 = tpu.matmul %8, %9, %cst_10 {dimension_numbers = #tpu.dot_dimension_numbers<[1], [0], [0], [1], [0, 0, 1, 1], [], []>} : vector<16x32xbf16>, vector<32x128xbf16>, vector<16x128xf32> -> vector<16x128xf32>
    %11 = arith.truncf %7 : vector<16x16xf32> to vector<16x16xbf16>
    %c0_11 = arith.constant 0 : index
    %c0_12 = arith.constant 0 : index
    %12 = vector.load %arg6[%c0_11, %c0_12] : memref<16x128xbf16, #tpu.memory_space<vmem>>, vector<16x128xbf16>
    %cst_13 = arith.constant dense<0.000000e+00> : vector<16x128xf32>
    %13 = tpu.matmul %11, %12, %cst_13 {dimension_numbers = #tpu.dot_dimension_numbers<[1], [0], [0], [1], [0, 0, 1, 1], [], []>} : vector<16x16xbf16>, vector<16x128xbf16>, vector<16x128xf32> -> vector<16x128xf32>
    %14 = arith.addf %10, %13 : vector<16x128xf32>
    %c0_14 = arith.constant 0 : index
    %c0_15 = arith.constant 0 : index
    %15 = vector.load %arg7[%c0_14, %c0_15] : memref<1x128xf32, #tpu.memory_space<vmem>>, vector<1x128xf32>
    %16 = vector.broadcast %15 : vector<1x128xf32> to vector<16x128xf32>
    %17 = arith.addf %14, %16 : vector<16x128xf32>
    %cst_16 = arith.constant 0.000000e+00 : f32
    %18 = vector.broadcast %cst_16 : f32 to vector<16x128xf32>
    %19 = arith.maximumf %17, %18 : vector<16x128xf32>
    %20 = arith.truncf %19 : vector<16x128xf32> to vector<16x128xbf16>
    %c0_17 = arith.constant 0 : index
    %c0_18 = arith.constant 0 : index
    %21 = vector.load %arg8[%c0_17, %c0_18] : memref<128x128xbf16, #tpu.memory_space<vmem>>, vector<128x128xbf16>
    %cst_19 = arith.constant dense<0.000000e+00> : vector<16x128xf32>
    %22 = tpu.matmul %20, %21, %cst_19 {dimension_numbers = #tpu.dot_dimension_numbers<[1], [0], [0], [1], [0, 0, 1, 1], [], []>} : vector<16x128xbf16>, vector<128x128xbf16>, vector<16x128xf32> -> vector<16x128xf32>
    %c0_20 = arith.constant 0 : index
    %c0_21 = arith.constant 0 : index
    %23 = vector.load %arg9[%c0_20, %c0_21] : memref<1x128xf32, #tpu.memory_space<vmem>>, vector<1x128xf32>
    %24 = vector.broadcast %23 : vector<1x128xf32> to vector<16x128xf32>
    %25 = arith.addf %22, %24 : vector<16x128xf32>
    %26 = arith.truncf %25 : vector<16x128xf32> to vector<16x128xbf16>
    %c0_22 = arith.constant 0 : index
    %c0_23 = arith.constant 0 : index
    %27 = vector.load %arg10[%c0_22, %c0_23] : memref<16x128xbf16, #tpu.memory_space<vmem>>, vector<16x128xbf16>
    tpu.vector_store %arg10[%c0_22, %c0_23], %26 {strides = array<i32>} : memref<16x128xbf16, #tpu.memory_space<vmem>>, vector<16x128xbf16>,
    return
  }
  func.func @transform_0(%arg0: i32) -> (i32, i32) {
    %c0_i32 = arith.constant 0 : i32
    %c0_i32_0 = arith.constant 0 : i32
    return %arg0, %c0_i32 : i32, i32
  }
  func.func @transform_1(%arg0: i32) -> (i32, i32) {
    %c0_i32 = arith.constant 0 : i32
    %c0_i32_0 = arith.constant 0 : i32
    return %arg0, %c0_i32 : i32, i32
  }
  func.func @transform_2(%arg0: i32) -> (i32, i32) {
    %c0_i32 = arith.constant 0 : i32
    %c0_i32_0 = arith.constant 0 : i32
    %c0_i32_1 = arith.constant 0 : i32
    return %c0_i32, %c0_i32_0 : i32, i32
  }
  func.func @transform_3(%arg0: i32) -> (i32, i32) {
    %c0_i32 = arith.constant 0 : i32
    %c0_i32_0 = arith.constant 0 : i32
    %c0_i32_1 = arith.constant 0 : i32
    return %c0_i32, %c0_i32_0 : i32, i32
  }
  func.func @transform_4(%arg0: i32) -> (i32, i32) {
    %c0_i32 = arith.constant 0 : i32
    %c0_i32_0 = arith.constant 0 : i32
    %c0_i32_1 = arith.constant 0 : i32
    return %c0_i32, %c0_i32_0 : i32, i32
  }
  func.func @transform_5(%arg0: i32) -> (i32, i32) {
    %c0_i32 = arith.constant 0 : i32
    %c0_i32_0 = arith.constant 0 : i32
    %c0_i32_1 = arith.constant 0 : i32
    return %c0_i32, %c0_i32_0 : i32, i32
  }
  func.func @transform_6(%arg0: i32) -> (i32, i32) {
    %c0_i32 = arith.constant 0 : i32
    %c0_i32_0 = arith.constant 0 : i32
    %c0_i32_1 = arith.constant 0 : i32
    return %c0_i32, %c0_i32_0 : i32, i32
  }
  func.func @transform_7(%arg0: i32) -> (i32, i32) {
    %c0_i32 = arith.constant 0 : i32
    %c0_i32_0 = arith.constant 0 : i32
    %c0_i32_1 = arith.constant 0 : i32
    return %c0_i32, %c0_i32_0 : i32, i32
  }
  func.func @transform_8(%arg0: i32) -> (i32, i32) {
    %c0_i32 = arith.constant 0 : i32
    %c0_i32_0 = arith.constant 0 : i32
    %c0_i32_1 = arith.constant 0 : i32
    return %c0_i32, %c0_i32_0 : i32, i32
  }
  func.func @transform_9(%arg0: i32) -> (i32, i32) {
    %c0_i32 = arith.constant 0 : i32
    %c0_i32_0 = arith.constant 0 : i32
    return %arg0, %c0_i32 : i32, i32
  }
}

module attributes {stable_mosaic.version = 11 : i64} {
  func.func @concat_combine_kernel(%arg0: i32, %arg1: memref<16x32xbf16, #tpu.memory_space<vmem>>, %arg2: memref<16x16xbf16, #tpu.memory_space<vmem>>, %arg3: memref<16x16xbf16, #tpu.memory_space<vmem>>, %arg4: memref<1x16xf32, #tpu.memory_space<vmem>>, %arg5: memref<32x128xbf16, #tpu.memory_space<vmem>>, %arg6: memref<16x128xbf16, #tpu.memory_space<vmem>>, %arg7: memref<1x128xf32, #tpu.memory_space<vmem>>, %arg8: memref<128x128xbf16, #tpu.memory_space<vmem>>, %arg9: memref<1x128xf32, #tpu.memory_space<vmem>>, %arg10: memref<16x128xbf16, #tpu.memory_space<vmem>>) attributes {dimension_semantics = [#tpu.dimension_semantics<parallel>], iteration_bounds = array<i64: 1>, scalar_prefetch = 0 : i64, scratch_operands = 0 : i64, tpu.core_type = #tpu.core_type<tc>, window_params = [{transform_indices = @transform_0, window_bounds = array<i64: 16, 32>}, {transform_indices = @transform_1, window_bounds = array<i64: 16, 16>}, {pipeline_mode = #tpu.pipeline_mode<synchronous>, transform_indices = @transform_2, window_bounds = array<i64: 16, 16>}, {pipeline_mode = #tpu.pipeline_mode<synchronous>, transform_indices = @transform_3, window_bounds = array<i64: 1, 16>}, {pipeline_mode = #tpu.pipeline_mode<synchronous>, transform_indices = @transform_4, window_bounds = array<i64: 32, 128>}, {pipeline_mode = #tpu.pipeline_mode<synchronous>, transform_indices = @transform_5, window_bounds = array<i64: 16, 128>}, {pipeline_mode = #tpu.pipeline_mode<synchronous>, transform_indices = @transform_6, window_bounds = array<i64: 1, 128>}, {pipeline_mode = #tpu.pipeline_mode<synchronous>, transform_indices = @transform_7, window_bounds = array<i64: 128, 128>}, {pipeline_mode = #tpu.pipeline_mode<synchronous>, transform_indices = @transform_8, window_bounds = array<i64: 1, 128>}, {transform_indices = @transform_9, window_bounds = array<i64: 16, 128>}]} {
    %c0 = arith.constant 0 : index
    %c0_0 = arith.constant 0 : index
    %0 = vector.load %arg2[%c0, %c0_0] : memref<16x16xbf16, #tpu.memory_space<vmem>>, vector<16x16xbf16>
    %c0_1 = arith.constant 0 : index
    %c0_2 = arith.constant 0 : index
    %1 = vector.load %arg3[%c0_1, %c0_2] : memref<16x16xbf16, #tpu.memory_space<vmem>>, vector<16x16xbf16>
    %cst = arith.constant dense<0.000000e+00> : vector<16x16xf32>
    %2 = tpu.matmul %0, %1, %cst {dimension_numbers = #tpu.dot_dimension_numbers<[1], [0], [0], [1], [0, 0, 1, 1], [], []>} : vector<16x16xbf16>, vector<16x16xbf16>, vector<16x16xf32> -> vector<16x16xf32>
    %c0_3 = arith.constant 0 : index
    %c0_4 = arith.constant 0 : index
    %3 = vector.load %arg4[%c0_3, %c0_4] : memref<1x16xf32, #tpu.memory_space<vmem>>, vector<1x16xf32>
    %4 = vector.broadcast %3 : vector<1x16xf32> to vector<16x16xf32>
    %5 = arith.addf %2, %4 : vector<16x16xf32>
    %cst_5 = arith.constant 0.000000e+00 : f32
    %6 = vector.broadcast %cst_5 : f32 to vector<16x16xf32>
    %7 = arith.maximumf %5, %6 : vector<16x16xf32>
    %c0_6 = arith.constant 0 : index
    %c0_7 = arith.constant 0 : index
    %8 = vector.load %arg1[%c0_6, %c0_7] : memref<16x32xbf16, #tpu.memory_space<vmem>>, vector<16x32xbf16>
    %c0_8 = arith.constant 0 : index
    %c0_9 = arith.constant 0 : index
    %9 = vector.load %arg5[%c0_8, %c0_9] : memref<32x128xbf16, #tpu.memory_space<vmem>>, vector<32x128xbf16>
    %cst_10 = arith.constant dense<0.000000e+00> : vector<16x128xf32>
    %10 = tpu.matmul %8, %9, %cst_10 {dimension_numbers = #tpu.dot_dimension_numbers<[1], [0], [0], [1], [0, 0, 1, 1], [], []>} : vector<16x32xbf16>, vector<32x128xbf16>, vector<16x128xf32> -> vector<16x128xf32>
    %11 = arith.truncf %7 : vector<16x16xf32> to vector<16x16xbf16>
    %c0_11 = arith.constant 0 : index
    %c0_12 = arith.constant 0 : index
    %12 = vector.load %arg6[%c0_11, %c0_12] : memref<16x128xbf16, #tpu.memory_space<vmem>>, vector<16x128xbf16>
    %cst_13 = arith.constant dense<0.000000e+00> : vector<16x128xf32>
    %13 = tpu.matmul %11, %12, %cst_13 {dimension_numbers = #tpu.dot_dimension_numbers<[1], [0], [0], [1], [0, 0, 1, 1], [], []>} : vector<16x16xbf16>, vector<16x128xbf16>, vector<16x128xf32> -> vector<16x128xf32>
    %14 = arith.addf %10, %13 : vector<16x128xf32>
    %c0_14 = arith.constant 0 : index
    %c0_15 = arith.constant 0 : index
    %15 = vector.load %arg7[%c0_14, %c0_15] : memref<1x128xf32, #tpu.memory_space<vmem>>, vector<1x128xf32>
    %16 = vector.broadcast %15 : vector<1x128xf32> to vector<16x128xf32>
    %17 = arith.addf %14, %16 : vector<16x128xf32>
    %cst_16 = arith.constant 0.000000e+00 : f32
    %18 = vector.broadcast %cst_16 : f32 to vector<16x128xf32>
    %19 = arith.maximumf %17, %18 : vector<16x128xf32>
    %20 = arith.truncf %19 : vector<16x128xf32> to vector<16x128xbf16>
    %c0_17 = arith.constant 0 : index
    %c0_18 = arith.constant 0 : index
    %21 = vector.load %arg8[%c0_17, %c0_18] : memref<128x128xbf16, #tpu.memory_space<vmem>>, vector<128x128xbf16>
    %cst_19 = arith.constant dense<0.000000e+00> : vector<16x128xf32>
    %22 = tpu.matmul %20, %21, %cst_19 {dimension_numbers = #tpu.dot_dimension_numbers<[1], [0], [0], [1], [0, 0, 1, 1], [], []>} : vector<16x128xbf16>, vector<128x128xbf16>, vector<16x128xf32> -> vector<16x128xf32>
    %c0_20 = arith.constant 0 : index
    %c0_21 = arith.constant 0 : index
    %23 = vector.load %arg9[%c0_20, %c0_21] : memref<1x128xf32, #tpu.memory_space<vmem>>, vector<1x128xf32>
    %24 = vector.broadcast %23 : vector<1x128xf32> to vector<16x128xf32>
    %25 = arith.addf %22, %24 : vector<16x128xf32>
    %26 = arith.truncf %25 : vector<16x128xf32> to vector<16x128xbf16>
    %c0_22 = arith.constant 0 : index
    %c0_23 = arith.constant 0 : index
    %27 = vector.load %arg10[%c0_22, %c0_23] : memref<16x128xbf16, #tpu.memory_space<vmem>>, vector<16x128xbf16>
    tpu.vector_store %arg10[%c0_22, %c0_23], %26 {strides = array<i32>} : memref<16x128xbf16, #tpu.memory_space<vmem>>, vector<16x128xbf16>,
    return
  }
  func.func @transform_0(%arg0: i32) -> (i32, i32) {
    %c0_i32 = arith.constant 0 : i32
    %c0_i32_0 = arith.constant 0 : i32
    return %arg0, %c0_i32 : i32, i32
  }
  func.func @transform_1(%arg0: i32) -> (i32, i32) {
    %c0_i32 = arith.constant 0 : i32
    %c0_i32_0 = arith.constant 0 : i32
    return %arg0, %c0_i32 : i32, i32
  }
  func.func @transform_2(%arg0: i32) -> (i32, i32) {
    %c0_i32 = arith.constant 0 : i32
    %c0_i32_0 = arith.constant 0 : i32
    %c0_i32_1 = arith.constant 0 : i32
    return %c0_i32, %c0_i32_0 : i32, i32
  }
  func.func @transform_3(%arg0: i32) -> (i32, i32) {
    %c0_i32 = arith.constant 0 : i32
    %c0_i32_0 = arith.constant 0 : i32
    %c0_i32_1 = arith.constant 0 : i32
    return %c0_i32, %c0_i32_0 : i32, i32
  }
  func.func @transform_4(%arg0: i32) -> (i32, i32) {
    %c0_i32 = arith.constant 0 : i32
    %c0_i32_0 = arith.constant 0 : i32
    %c0_i32_1 = arith.constant 0 : i32
    return %c0_i32, %c0_i32_0 : i32, i32
  }
  func.func @transform_5(%arg0: i32) -> (i32, i32) {
    %c0_i32 = arith.constant 0 : i32
    %c0_i32_0 = arith.constant 0 : i32
    %c0_i32_1 = arith.constant 0 : i32
    return %c0_i32, %c0_i32_0 : i32, i32
  }
  func.func @transform_6(%arg0: i32) -> (i32, i32) {
    %c0_i32 = arith.constant 0 : i32
    %c0_i32_0 = arith.constant 0 : i32
    %c0_i32_1 = arith.constant 0 : i32
    return %c0_i32, %c0_i32_0 : i32, i32
  }
  func.func @transform_7(%arg0: i32) -> (i32, i32) {
    %c0_i32 = arith.constant 0 : i32
    %c0_i32_0 = arith.constant 0 : i32
    %c0_i32_1 = arith.constant 0 : i32
    return %c0_i32, %c0_i32_0 : i32, i32
  }
  func.func @transform_8(%arg0: i32) -> (i32, i32) {
    %c0_i32 = arith.constant 0 : i32
    %c0_i32_0 = arith.constant 0 : i32
    %c0_i32_1 = arith.constant 0 : i32
    return %c0_i32, %c0_i32_0 : i32, i32
  }
  func.func @transform_9(%arg0: i32) -> (i32, i32) {
    %c0_i32 = arith.constant 0 : i32
    %c0_i32_0 = arith.constant 0 : i32
    return %arg0, %c0_i32 : i32, i32
  }
}

</mosaic_0001>

<bundles_post_ra>
// kernel: tpu_custom_call.1
= control target key start
LH: loop header
LB: loop body
LE: loop exit
PB: predicated region body
PF: predicated region fallthrough
CT: control target
= control target key end

     0   :  { %14 = vsyncpa [#allocation3], 0  ;;  %s796_s0 = inlined_call_operand.hbm [shape: bf16[16,32], index: 0, kind: input, shape index: {}]   ;;  %s797_s1 = inlined_call_operand.hbm [shape: bf16[16,16], index: 1, kind: input, shape index: {}]   ;;  %s798_s2 = inlined_call_operand.hbm [shape: bf16[16,16], index: 2, kind: input, shape index: {}]   ;;  %s799_s3 = inlined_call_operand.vmem [shape: f32[1,16], index: 3, kind: input, shape index: {}]   ;;  %s800_s4 = inlined_call_operand.hbm [shape: bf16[32,128], index: 4, kind: input, shape index: {}]   ;;  %s801_s5 = inlined_call_operand.vmem [shape: bf16[16,128], index: 5, kind: input, shape index: {}]   ;;  %s802_s6 = inlined_call_operand.vmem [shape: f32[1,128], index: 6, kind: input, shape index: {}]   ;;  %s803_s7 = inlined_call_operand.hbm [shape: bf16[128,128], index: 7, kind: input, shape index: {}]   ;;  %s804_s8 = inlined_call_operand.vmem [shape: f32[1,128], index: 8, kind: input, shape index: {}]   ;;  %s805_s9 = inlined_call_operand.hbm [shape: bf16[16,128], index: 9, kind: output, shape index: {}]  }
   0x1   :  { %15 = vsyncpa [#allocation6], 0 }
   0x2   :  { %16 = vsyncpa [#allocation9], 0 }
   0x3   :  { %17 = vsyncpa [#allocation4], 0  ;;  %s682_s30 = smov [#allocation5]   ;;  %s683_s11 = smov [#allocation8]  }
   0x4   :  { %s35_s10 = sshll.u32 %s682_s30, 4  ;;  %s61_s12 = sshll.u32 %s683_s11, 4  ;;  %s36_s10 = int_to_ptr.vmem [resolvable:$true] %s35_s10  ;;  %s62_s12 = int_to_ptr.vmem [resolvable:$true] %s61_s12 }
   0x5   :  { %s562_s13 = scalar_lea.vmem %s36_s10, 128  ;;  %p567_p1 = scmp.lt.s32.totalorder %s36_s10, %s36_s10 }
   0x6   :  { %p563_p0 = scmp.ne.s32.totalorder %s36_s10, %s562_s13  ;;  %p568_p2 = scmp.lt.s32.totalorder %s562_s13, %s562_s13 }
   0x8   :  { %p569_p3 = por %p568_p2, %p567_p1 }
   0xa   :  { %p570_p4 = pnand %p569_p3, %p563_p0 }
   0xc   :  { %573 = shalt.err (!%p570_p4)
}
   0xd   :  { %s684_s14 = smov 64   ;;  %s685_s15 = smov 4  }
   0xe   :  { %41 = dma.hbm_to_vmem [thread:$0]  %s797_s1, 128, %s36_s10, [#allocation6], %s684_s14, %s684_s14, %s685_s15  }
   0xf   :  { %s582_s18 = scalar_lea.vmem %s62_s12, 256  ;;  %p587_p6 = scmp.lt.s32.totalorder %s62_s12, %s62_s12 }
  0x10   :  { %p583_p5 = scmp.ne.s32.totalorder %s62_s12, %s582_s18  ;;  %p588_p7 = scmp.lt.s32.totalorder %s582_s18, %s582_s18 }
  0x12   :  { %p589_p8 = por %p588_p7, %p587_p6 }
  0x14   :  { %p590_p9 = pnand %p589_p8, %p583_p5 }
  0x16   :  { %593 = shalt.err (!%p590_p9)
}
  0x17   :  { %67 = dma.hbm_to_vmem [thread:$0]  %s800_s4, 256, %s62_s12, [#allocation9], %s684_s14, %s684_s14, %s685_s15  }
  0x18   :  { %s686_s21 = smov [#allocation2]   ;;  %s687_s23 = smov [#allocation7]  }
  0x19   :  { %s23_s22 = sshll.u32 %s686_s21, 4  ;;  %s47_s24 = sshll.u32 %s687_s23, 4  ;;  %s24_s22 = int_to_ptr.vmem [resolvable:$true] %s23_s22  ;;  %s48_s24 = int_to_ptr.vmem [resolvable:$true] %s47_s24 }
  0x1a   :  { %s602_s1 = scalar_lea.vmem %s24_s22, 128  ;;  %p607_p11 = scmp.lt.s32.totalorder %s24_s22, %s24_s22 }
  0x1b   :  { %p603_p10 = scmp.ne.s32.totalorder %s24_s22, %s602_s1  ;;  %p608_p12 = scmp.lt.s32.totalorder %s602_s1, %s602_s1 }
  0x1d   :  { %p609_p13 = por %p608_p12, %p607_p11 }
  0x1f   :  { %p610_p0 = pnand %p609_p13, %p603_p10 }
  0x21   :  { %613 = shalt.err (!%p610_p0)
}
  0x22   :  { %29 = dma.hbm_to_vmem [thread:$0]  %s796_s0, 128, %s24_s22, [#allocation3], %s684_s14, %s684_s14, %s685_s15  }
  0x23   :  { %s622_s4 = scalar_lea.vmem %s48_s24, 128  ;;  %p627_p2 = scmp.lt.s32.totalorder %s48_s24, %s48_s24 }
  0x24   :  { %p623_p1 = scmp.ne.s32.totalorder %s48_s24, %s622_s4  ;;  %p628_p3 = scmp.lt.s32.totalorder %s622_s4, %s622_s4 }
  0x26   :  { %p629_p4 = por %p628_p3, %p627_p2 }
  0x28   :  { %p630_p5 = pnand %p629_p4, %p623_p1 }
  0x2a   :  { %633 = shalt.err (!%p630_p5)
}
  0x2b   :  { %53 = dma.hbm_to_vmem [thread:$0]  %s798_s2, 128, %s48_s24, [#allocation6], %s684_s14, %s684_s14, %s685_s15  }
  0x2c   :  { %s688_s29 = smov [#allocation10]  }
  0x2d   :  { %s77_s30 = sshll.u32 %s688_s29, 4  ;;  %s78_s30 = int_to_ptr.vmem [resolvable:$true] %s77_s30 }
  0x2e   :  { %s642_s10 = scalar_lea.vmem %s78_s30, 1024  ;;  %p647_p7 = scmp.lt.s32.totalorder %s78_s30, %s78_s30 }
  0x2f   :  { %p643_p6 = scmp.ne.s32.totalorder %s78_s30, %s642_s10  ;;  %p648_p8 = scmp.lt.s32.totalorder %s642_s10, %s642_s10 }
  0x31   :  { %p649_p9 = por %p648_p8, %p647_p7 }
  0x33   :  { %p650_p10 = pnand %p649_p9, %p643_p6 }
  0x35   :  { %653 = shalt.err (!%p650_p10)
}
  0x36   :  { %83 = dma.hbm_to_vmem [thread:$0]  %s803_s7, 1024, %s78_s30, [#allocation9], %s684_s14, %s684_s14, %s685_s15  }
  0x37   :  { %674 = dma.done.wait [#allocation3], 128  }
  0x38   :  { %675 = vsyncadd [#allocation3], 4294967168 }
  0x39   :  { %676 = dma.done.wait [#allocation6], 256  }
  0x3a   :  { %677 = vsyncadd [#allocation6], 4294967040 }
  0x3b   :  { %678 = dma.done.wait [#allocation9], 1280  }
  0x3c   :  { %679 = vsyncadd [#allocation9], 4294966016  ;;  %v689_v0 = vmov 0.0   ;;  %vm690_vm0 = vmmov 0   ;;  %v540_v1 = vld [vmem:[#allocation7] sm:$0xff]   ;;  %v541_v2 = vld [vmem:[#allocation5] sm:$0xff]  }
  0x3d   :  { %490 = vmatprep.subr.bf16.mxu0 %v689_v0  ;;  %492 = vmatprep.mubr.msk.bf16.mxu0 %vm690_vm0, %v689_v0  ;;  %vm124_vm1 = vcmask 130048   ;;  %v542_v3 = vld [vmem:[%s801_s5] sm:$0xff]   ;;  %v547_v5 = vld [vmem:[#allocation10 + $0x30] sm:$0xff]   ;;  %v548_v6 = vld [vmem:[#allocation10 + $0x28] sm:$0xff]   ;;  %vm247_vm2 = vcmask 261120   ;;  %s691_s18 = smov [#allocation11]  }
  0x3e   :  { %510 = vmatprep.subr.bf16.mxu1 %v689_v0  ;;  %526 = vmatprep.mubr.msk.bf16.mxu1 %vm690_vm0, %v689_v0  ;;  %v546_v4 = vld [vmem:[#allocation10 + $0x38] sm:$0xff]   ;;  %v544_v18 = vld [vmem:[#allocation8] sm:$0xff]   ;;  %v549_v20 = vld [vmem:[#allocation10 + $0x20] sm:$0xff]   ;;  %s431_s19 = sshll.u32 %s691_s18, 4  ;;  %s432_s19 = int_to_ptr.vmem [resolvable:$true] %s431_s19 }
  0x3f   :  { %491 = vmatpush3.bf16.msra.mxu0 %v540_v1  ;;  %511 = vmatpush3.bf16.msra.mxu1 %v546_v4  ;;  %v445_v7 = vld [vmem:[%s799_s3] ss:$0 sm:$0xff]  ;;  %v551_v22 = vld [vmem:[#allocation10 + $0x10] sm:$0xff]   ;;  %v552_v23 = vld [vmem:[#allocation10 + $0x8] sm:$0xff]   ;;  %p659_p12 = scmp.lt.s32.totalorder %s432_s19, %s432_s19 }
  0x40   :  { %496 = vmatprep.subr.bf16.mxu0 %v689_v0  ;;  %512 = vmatprep.subr.bf16.mxu1 %v689_v0  ;;  %v543_v16 = vld [vmem:[#allocation8 + $0x8] sm:$0xff]   ;;  %v553_v24 = vld [vmem:[#allocation10] sm:$0xff]  }
  0x41   :  { %v545_v19 = vld [vmem:[#allocation2] sm:$0xff]  }
  0x42   :  { %493 = vmatmul.mubr.msk.bf16.vlgmr.msra.gmra.mxu0 %vm124_vm1, %v541_v2  ;;  %v550_v21 = vld [vmem:[#allocation10 + $0x18] sm:$0xff]  }
  0x43   :  { %498 = vmatprep.mubr.msk.bf16.mxu0 %vm690_vm0, %v689_v0  ;;  %497 = vmatpush3.bf16.msra.mxu0 %v542_v3  ;;  %v455_v31 = vld [vmem:[%s802_s6] ss:$0 sm:$0xff]  ;;  %s654_s6 = scalar_lea.vmem %s432_s19, 128 }
  0x44   :  { %502 = vmatprep.subr.bf16.mxu0 %v689_v0  ;;  %513 = vmatpush3.bf16.msra.mxu1 %v547_v5  ;;  %v456_v42 = vld [vmem:[%s804_s8] ss:$0 sm:$0xff]  ;;  %p655_p11 = scmp.ne.s32.totalorder %s432_s19, %s654_s6  ;;  %p660_p13 = scmp.lt.s32.totalorder %s654_s6, %s654_s6 }
  0x45   :  { %514 = vmatprep.subr.bf16.mxu1 %v689_v0 }
  0x46   :  { %p661_p0 = por %p660_p13, %p659_p12 }
  0x48   :  { %515 = vmatpush3.bf16.msra.mxu1 %v548_v6  ;;  %p662_p1 = pnand %p661_p0, %p655_p11 }
  0x49   :  { %516 = vmatprep.subr.bf16.mxu1 %v689_v0 }
  0x4c   :  { %517 = vmatpush3.bf16.msra.mxu1 %v549_v20 }
  0x4d   :  { %518 = vmatprep.subr.bf16.mxu1 %v689_v0 }
  0x50   :  { %519 = vmatpush3.bf16.msra.mxu1 %v550_v21 }
  0x51   :  { %520 = vmatprep.subr.bf16.mxu1 %v689_v0 }
  0x54   :  { %521 = vmatpush3.bf16.msra.mxu1 %v551_v22 }
  0x55   :  { %522 = vmatprep.subr.bf16.mxu1 %v689_v0 }
  0x58   :  { %523 = vmatpush3.bf16.msra.mxu1 %v552_v23 }
  0x59   :  { %524 = vmatprep.subr.bf16.mxu1 %v689_v0 }
  0x5c   :  { %525 = vmatpush3.bf16.msra.mxu1 %v553_v24 }
 0x102   :  { %v162_v8 = vpop.f32.mrf.mxu0 }
 0x103   :  { %v163_v10 = vadd.f32 %v445_v7, %v162_v8 }
 0x104   :  { %v494_v9 = vpop.f32.mrf.mxu0 }
 0x105   :  { %v169_v14 = vmax.f32 %v163_v10, 0.0 }
 0x106   :  { %v165_v11 = vpop.f32.mrf.mxu0 }
 0x107   :  { %v166_v12 = vadd.f32 %v445_v7, %v165_v11 }
 0x108   :  { %v495_v13 = vpop.f32.mrf.mxu0 }
 0x109   :  { %v170_v15 = vmax.f32 %v166_v12, 0.0 }
 0x10b   :  { %v177_v17 = vpack.c.bf16 %v170_v15, %v169_v14 }
 0x10d   :  { %499 = vmatmul.mubr.msk.bf16.vlgmr.msra.gmra.mxu0 %vm124_vm1, %v177_v17 }
 0x10e   :  { %503 = vmatpush3.bf16.msra.mxu0 %v543_v16  ;;  %506 = vmatprep.mubr.msk.bf16.mxu0 %vm690_vm0, %v689_v0 }
 0x10f   :  { %504 = vmatprep.subr.bf16.mxu0 %v689_v0 }
 0x112   :  { %505 = vmatpush3.bf16.msra.mxu0 %v544_v18 }
 0x115   :  { %507 = vmatmul.mubr.msk.bf16.vlgmr.msra.gmra.mxu0 %vm247_vm2, %v545_v19 }
 0x1cd   :  { %v223_v25 = vpop.f32.mrf.mxu0 }
 0x1cf   :  { %v500_v26 = vpop.f32.mrf.mxu0 }
 0x1d1   :  { %v226_v27 = vpop.f32.mrf.mxu0 }
 0x1d3   :  { %v501_v28 = vpop.f32.mrf.mxu0 }
 0x1d5   :  { %v285_v29 = vpop.f32.mrf.mxu0 }
 0x1d6   :  { %v286_v30 = vadd.f32 %v285_v29, %v223_v25 }
 0x1d7   :  { %v508_v32 = vpop.f32.mrf.mxu0 }
 0x1d8   :  { %v299_v34 = vadd.f32 %v455_v31, %v286_v30 }
 0x1d9   :  { %v288_v33 = vpop.f32.mrf.mxu0 }
 0x1da   :  { %v289_v35 = vadd.f32 %v288_v33, %v226_v27  ;;  %v301_v38 = vmax.f32 %v299_v34, 0.0 }
 0x1db   :  { %v509_v36 = vpop.f32.mrf.mxu0 }
 0x1dc   :  { %v300_v37 = vadd.f32 %v455_v31, %v289_v35 }
 0x1de   :  { %v302_v39 = vmax.f32 %v300_v37, 0.0 }
 0x1e0   :  { %v303_v40 = vpack.c.bf16 %v302_v39, %v301_v38 }
 0x1e2   :  { %527 = vmatmul.mubr.bf16.vlgmr.msra.gmra.mxu1 %v303_v40 }
 0x2a2   :  { %v409_v41 = vpop.f32.mrf.mxu1 }
 0x2a3   :  { %v410_v45 = vadd.f32 %v456_v42, %v409_v41 }
 0x2a4   :  { %v528_v43 = vpop.f32.mrf.mxu1 }
 0x2a6   :  { %v412_v44 = vpop.f32.mrf.mxu1 }
 0x2a7   :  { %v413_v46 = vadd.f32 %v456_v42, %v412_v44 }
 0x2a8   :  { %v529_v47 = vpop.f32.mrf.mxu1 }
 0x2a9   :  { %v472_v48 = vpack.c.bf16 %v413_v46, %v410_v45 }
 0x2ab   :  { %473 = vst [vmem:[#allocation11] sm:$0xff] %v472_v48  }
 0x2ac   :  { %665 = shalt.err (!%p662_p1)
}
 0x2ad   :  { %437 = dma.vmem_to_hbm [thread:$0]  %s432_s19, 128, %s805_s9, [#allocation4], %s684_s14, %s684_s14, %s685_s15  }
 0x2ae   :  { %680 = dma.done.wait [#allocation4], 128  }
 0x2af   :  { %681 = vsyncadd [#allocation4], 4294967168 }
 0x2b0   :  { %441 = vsyncpa [#allocation3], 1 }
 0x2b1   :  { %442 = vsyncpa [#allocation6], 1 }
 0x2b2   :  { %443 = vsyncpa [#allocation9], 1 }
 0x2b3   :  { %444 = vsyncpa [#allocation4], 1 }

// kernel: tpu_custom_call.1
= control target key start
LH: loop header
LB: loop body
LE: loop exit
PB: predicated region body
PF: predicated region fallthrough
CT: control target
= control target key end

     0   :  { %14 = vsyncpa [#allocation3], 0  ;;  %s796_s0 = inlined_call_operand.hbm [shape: bf16[16,32], index: 0, kind: input, shape index: {}]   ;;  %s797_s1 = inlined_call_operand.hbm [shape: bf16[16,16], index: 1, kind: input, shape index: {}]   ;;  %s798_s2 = inlined_call_operand.hbm [shape: bf16[16,16], index: 2, kind: input, shape index: {}]   ;;  %s799_s3 = inlined_call_operand.vmem [shape: f32[1,16], index: 3, kind: input, shape index: {}]   ;;  %s800_s4 = inlined_call_operand.hbm [shape: bf16[32,128], index: 4, kind: input, shape index: {}]   ;;  %s801_s5 = inlined_call_operand.vmem [shape: bf16[16,128], index: 5, kind: input, shape index: {}]   ;;  %s802_s6 = inlined_call_operand.vmem [shape: f32[1,128], index: 6, kind: input, shape index: {}]   ;;  %s803_s7 = inlined_call_operand.hbm [shape: bf16[128,128], index: 7, kind: input, shape index: {}]   ;;  %s804_s8 = inlined_call_operand.vmem [shape: f32[1,128], index: 8, kind: input, shape index: {}]   ;;  %s805_s9 = inlined_call_operand.hbm [shape: bf16[16,128], index: 9, kind: output, shape index: {}]  }
   0x1   :  { %15 = vsyncpa [#allocation6], 0 }
   0x2   :  { %16 = vsyncpa [#allocation9], 0 }
   0x3   :  { %17 = vsyncpa [#allocation4], 0  ;;  %s682_s30 = smov [#allocation5]   ;;  %s683_s11 = smov [#allocation8]  }
   0x4   :  { %s35_s10 = sshll.u32 %s682_s30, 4  ;;  %s61_s12 = sshll.u32 %s683_s11, 4  ;;  %s36_s10 = int_to_ptr.vmem [resolvable:$true] %s35_s10  ;;  %s62_s12 = int_to_ptr.vmem [resolvable:$true] %s61_s12 }
   0x5   :  { %s562_s13 = scalar_lea.vmem %s36_s10, 128  ;;  %p567_p1 = scmp.lt.s32.totalorder %s36_s10, %s36_s10 }
   0x6   :  { %p563_p0 = scmp.ne.s32.totalorder %s36_s10, %s562_s13  ;;  %p568_p2 = scmp.lt.s32.totalorder %s562_s13, %s562_s13 }
   0x8   :  { %p569_p3 = por %p568_p2, %p567_p1 }
   0xa   :  { %p570_p4 = pnand %p569_p3, %p563_p0 }
   0xc   :  { %573 = shalt.err (!%p570_p4)
}
   0xd   :  { %s684_s14 = smov 64   ;;  %s685_s15 = smov 4  }
   0xe   :  { %41 = dma.hbm_to_vmem [thread:$0]  %s797_s1, 128, %s36_s10, [#allocation6], %s684_s14, %s684_s14, %s685_s15  }
   0xf   :  { %s582_s18 = scalar_lea.vmem %s62_s12, 256  ;;  %p587_p6 = scmp.lt.s32.totalorder %s62_s12, %s62_s12 }
  0x10   :  { %p583_p5 = scmp.ne.s32.totalorder %s62_s12, %s582_s18  ;;  %p588_p7 = scmp.lt.s32.totalorder %s582_s18, %s582_s18 }
  0x12   :  { %p589_p8 = por %p588_p7, %p587_p6 }
  0x14   :  { %p590_p9 = pnand %p589_p8, %p583_p5 }
  0x16   :  { %593 = shalt.err (!%p590_p9)
}
  0x17   :  { %67 = dma.hbm_to_vmem [thread:$0]  %s800_s4, 256, %s62_s12, [#allocation9], %s684_s14, %s684_s14, %s685_s15  }
  0x18   :  { %s686_s21 = smov [#allocation2]   ;;  %s687_s23 = smov [#allocation7]  }
  0x19   :  { %s23_s22 = sshll.u32 %s686_s21, 4  ;;  %s47_s24 = sshll.u32 %s687_s23, 4  ;;  %s24_s22 = int_to_ptr.vmem [resolvable:$true] %s23_s22  ;;  %s48_s24 = int_to_ptr.vmem [resolvable:$true] %s47_s24 }
  0x1a   :  { %s602_s1 = scalar_lea.vmem %s24_s22, 128  ;;  %p607_p11 = scmp.lt.s32.totalorder %s24_s22, %s24_s22 }
  0x1b   :  { %p603_p10 = scmp.ne.s32.totalorder %s24_s22, %s602_s1  ;;  %p608_p12 = scmp.lt.s32.totalorder %s602_s1, %s602_s1 }
  0x1d   :  { %p609_p13 = por %p608_p12, %p607_p11 }
  0x1f   :  { %p610_p0 = pnand %p609_p13, %p603_p10 }
  0x21   :  { %613 = shalt.err (!%p610_p0)
}
  0x22   :  { %29 = dma.hbm_to_vmem [thread:$0]  %s796_s0, 128, %s24_s22, [#allocation3], %s684_s14, %s684_s14, %s685_s15  }
  0x23   :  { %s622_s4 = scalar_lea.vmem %s48_s24, 128  ;;  %p627_p2 = scmp.lt.s32.totalorder %s48_s24, %s48_s24 }
  0x24   :  { %p623_p1 = scmp.ne.s32.totalorder %s48_s24, %s622_s4  ;;  %p628_p3 = scmp.lt.s32.totalorder %s622_s4, %s622_s4 }
  0x26   :  { %p629_p4 = por %p628_p3, %p627_p2 }
  0x28   :  { %p630_p5 = pnand %p629_p4, %p623_p1 }
  0x2a   :  { %633 = shalt.err (!%p630_p5)
}
  0x2b   :  { %53 = dma.hbm_to_vmem [thread:$0]  %s798_s2, 128, %s48_s24, [#allocation6], %s684_s14, %s684_s14, %s685_s15  }
  0x2c   :  { %s688_s29 = smov [#allocation10]  }
  0x2d   :  { %s77_s30 = sshll.u32 %s688_s29, 4  ;;  %s78_s30 = int_to_ptr.vmem [resolvable:$true] %s77_s30 }
  0x2e   :  { %s642_s10 = scalar_lea.vmem %s78_s30, 1024  ;;  %p647_p7 = scmp.lt.s32.totalorder %s78_s30, %s78_s30 }
  0x2f   :  { %p643_p6 = scmp.ne.s32.totalorder %s78_s30, %s642_s10  ;;  %p648_p8 = scmp.lt.s32.totalorder %s642_s10, %s642_s10 }
  0x31   :  { %p649_p9 = por %p648_p8, %p647_p7 }
  0x33   :  { %p650_p10 = pnand %p649_p9, %p643_p6 }
  0x35   :  { %653 = shalt.err (!%p650_p10)
}
  0x36   :  { %83 = dma.hbm_to_vmem [thread:$0]  %s803_s7, 1024, %s78_s30, [#allocation9], %s684_s14, %s684_s14, %s685_s15  }
  0x37   :  { %674 = dma.done.wait [#allocation3], 128  }
  0x38   :  { %675 = vsyncadd [#allocation3], 4294967168 }
  0x39   :  { %676 = dma.done.wait [#allocation6], 256  }
  0x3a   :  { %677 = vsyncadd [#allocation6], 4294967040 }
  0x3b   :  { %678 = dma.done.wait [#allocation9], 1280  }
  0x3c   :  { %679 = vsyncadd [#allocation9], 4294966016  ;;  %v689_v0 = vmov 0.0   ;;  %vm690_vm0 = vmmov 0   ;;  %v540_v1 = vld [vmem:[#allocation7] sm:$0xff]   ;;  %v541_v2 = vld [vmem:[#allocation5] sm:$0xff]  }
  0x3d   :  { %490 = vmatprep.subr.bf16.mxu0 %v689_v0  ;;  %492 = vmatprep.mubr.msk.bf16.mxu0 %vm690_vm0, %v689_v0  ;;  %vm124_vm1 = vcmask 130048   ;;  %v542_v3 = vld [vmem:[%s801_s5] sm:$0xff]   ;;  %v547_v5 = vld [vmem:[#allocation10 + $0x30] sm:$0xff]   ;;  %v548_v6 = vld [vmem:[#allocation10 + $0x28] sm:$0xff]   ;;  %vm247_vm2 = vcmask 261120   ;;  %s691_s18 = smov [#allocation11]  }
  0x3e   :  { %510 = vmatprep.subr.bf16.mxu1 %v689_v0  ;;  %526 = vmatprep.mubr.msk.bf16.mxu1 %vm690_vm0, %v689_v0  ;;  %v546_v4 = vld [vmem:[#allocation10 + $0x38] sm:$0xff]   ;;  %v544_v18 = vld [vmem:[#allocation8] sm:$0xff]   ;;  %v549_v20 = vld [vmem:[#allocation10 + $0x20] sm:$0xff]   ;;  %s431_s19 = sshll.u32 %s691_s18, 4  ;;  %s432_s19 = int_to_ptr.vmem [resolvable:$true] %s431_s19 }
  0x3f   :  { %491 = vmatpush3.bf16.msra.mxu0 %v540_v1  ;;  %511 = vmatpush3.bf16.msra.mxu1 %v546_v4  ;;  %v445_v7 = vld [vmem:[%s799_s3] ss:$0 sm:$0xff]  ;;  %v551_v22 = vld [vmem:[#allocation10 + $0x10] sm:$0xff]   ;;  %v552_v23 = vld [vmem:[#allocation10 + $0x8] sm:$0xff]   ;;  %p659_p12 = scmp.lt.s32.totalorder %s432_s19, %s432_s19 }
  0x40   :  { %496 = vmatprep.subr.bf16.mxu0 %v689_v0  ;;  %512 = vmatprep.subr.bf16.mxu1 %v689_v0  ;;  %v543_v16 = vld [vmem:[#allocation8 + $0x8] sm:$0xff]   ;;  %v553_v24 = vld [vmem:[#allocation10] sm:$0xff]  }
  0x41   :  { %v545_v19 = vld [vmem:[#allocation2] sm:$0xff]  }
  0x42   :  { %493 = vmatmul.mubr.msk.bf16.vlgmr.msra.gmra.mxu0 %vm124_vm1, %v541_v2  ;;  %v550_v21 = vld [vmem:[#allocation10 + $0x18] sm:$0xff]  }
  0x43   :  { %498 = vmatprep.mubr.msk.bf16.mxu0 %vm690_vm0, %v689_v0  ;;  %497 = vmatpush3.bf16.msra.mxu0 %v542_v3  ;;  %v455_v31 = vld [vmem:[%s802_s6] ss:$0 sm:$0xff]  ;;  %s654_s6 = scalar_lea.vmem %s432_s19, 128 }
  0x44   :  { %502 = vmatprep.subr.bf16.mxu0 %v689_v0  ;;  %513 = vmatpush3.bf16.msra.mxu1 %v547_v5  ;;  %v456_v42 = vld [vmem:[%s804_s8] ss:$0 sm:$0xff]  ;;  %p655_p11 = scmp.ne.s32.totalorder %s432_s19, %s654_s6  ;;  %p660_p13 = scmp.lt.s32.totalorder %s654_s6, %s654_s6 }
  0x45   :  { %514 = vmatprep.subr.bf16.mxu1 %v689_v0 }
  0x46   :  { %p661_p0 = por %p660_p13, %p659_p12 }
  0x48   :  { %515 = vmatpush3.bf16.msra.mxu1 %v548_v6  ;;  %p662_p1 = pnand %p661_p0, %p655_p11 }
  0x49   :  { %516 = vmatprep.subr.bf16.mxu1 %v689_v0 }
  0x4c   :  { %517 = vmatpush3.bf16.msra.mxu1 %v549_v20 }
  0x4d   :  { %518 = vmatprep.subr.bf16.mxu1 %v689_v0 }
  0x50   :  { %519 = vmatpush3.bf16.msra.mxu1 %v550_v21 }
  0x51   :  { %520 = vmatprep.subr.bf16.mxu1 %v689_v0 }
  0x54   :  { %521 = vmatpush3.bf16.msra.mxu1 %v551_v22 }
  0x55   :  { %522 = vmatprep.subr.bf16.mxu1 %v689_v0 }
  0x58   :  { %523 = vmatpush3.bf16.msra.mxu1 %v552_v23 }
  0x59   :  { %524 = vmatprep.subr.bf16.mxu1 %v689_v0 }
  0x5c   :  { %525 = vmatpush3.bf16.msra.mxu1 %v553_v24 }
 0x102   :  { %v162_v8 = vpop.f32.mrf.mxu0 }
 0x103   :  { %v163_v10 = vadd.f32 %v445_v7, %v162_v8 }
 0x104   :  { %v494_v9 = vpop.f32.mrf.mxu0 }
 0x105   :  { %v169_v14 = vmax.f32 %v163_v10, 0.0 }
 0x106   :  { %v165_v11 = vpop.f32.mrf.mxu0 }
 0x107   :  { %v166_v12 = vadd.f32 %v445_v7, %v165_v11 }
 0x108   :  { %v495_v13 = vpop.f32.mrf.mxu0 }
 0x109   :  { %v170_v15 = vmax.f32 %v166_v12, 0.0 }
 0x10b   :  { %v177_v17 = vpack.c.bf16 %v170_v15, %v169_v14 }
 0x10d   :  { %499 = vmatmul.mubr.msk.bf16.vlgmr.msra.gmra.mxu0 %vm124_vm1, %v177_v17 }
 0x10e   :  { %503 = vmatpush3.bf16.msra.mxu0 %v543_v16  ;;  %506 = vmatprep.mubr.msk.bf16.mxu0 %vm690_vm0, %v689_v0 }
 0x10f   :  { %504 = vmatprep.subr.bf16.mxu0 %v689_v0 }
 0x112   :  { %505 = vmatpush3.bf16.msra.mxu0 %v544_v18 }
 0x115   :  { %507 = vmatmul.mubr.msk.bf16.vlgmr.msra.gmra.mxu0 %vm247_vm2, %v545_v19 }
 0x1cd   :  { %v223_v25 = vpop.f32.mrf.mxu0 }
 0x1cf   :  { %v500_v26 = vpop.f32.mrf.mxu0 }
 0x1d1   :  { %v226_v27 = vpop.f32.mrf.mxu0 }
 0x1d3   :  { %v501_v28 = vpop.f32.mrf.mxu0 }
 0x1d5   :  { %v285_v29 = vpop.f32.mrf.mxu0 }
 0x1d6   :  { %v286_v30 = vadd.f32 %v285_v29, %v223_v25 }
 0x1d7   :  { %v508_v32 = vpop.f32.mrf.mxu0 }
 0x1d8   :  { %v299_v34 = vadd.f32 %v455_v31, %v286_v30 }
 0x1d9   :  { %v288_v33 = vpop.f32.mrf.mxu0 }
 0x1da   :  { %v289_v35 = vadd.f32 %v288_v33, %v226_v27  ;;  %v301_v38 = vmax.f32 %v299_v34, 0.0 }
 0x1db   :  { %v509_v36 = vpop.f32.mrf.mxu0 }
 0x1dc   :  { %v300_v37 = vadd.f32 %v455_v31, %v289_v35 }
 0x1de   :  { %v302_v39 = vmax.f32 %v300_v37, 0.0 }
 0x1e0   :  { %v303_v40 = vpack.c.bf16 %v302_v39, %v301_v38 }
 0x1e2   :  { %527 = vmatmul.mubr.bf16.vlgmr.msra.gmra.mxu1 %v303_v40 }
 0x2a2   :  { %v409_v41 = vpop.f32.mrf.mxu1 }
 0x2a3   :  { %v410_v45 = vadd.f32 %v456_v42, %v409_v41 }
 0x2a4   :  { %v528_v43 = vpop.f32.mrf.mxu1 }
 0x2a6   :  { %v412_v44 = vpop.f32.mrf.mxu1 }
 0x2a7   :  { %v413_v46 = vadd.f32 %v456_v42, %v412_v44 }
 0x2a8   :  { %v529_v47 = vpop.f32.mrf.mxu1 }
 0x2a9   :  { %v472_v48 = vpack.c.bf16 %v413_v46, %v410_v45 }
 0x2ab   :  { %473 = vst [vmem:[#allocation11] sm:$0xff] %v472_v48  }
 0x2ac   :  { %665 = shalt.err (!%p662_p1)
}
 0x2ad   :  { %437 = dma.vmem_to_hbm [thread:$0]  %s432_s19, 128, %s805_s9, [#allocation4], %s684_s14, %s684_s14, %s685_s15  }
 0x2ae   :  { %680 = dma.done.wait [#allocation4], 128  }
 0x2af   :  { %681 = vsyncadd [#allocation4], 4294967168 }
 0x2b0   :  { %441 = vsyncpa [#allocation3], 1 }
 0x2b1   :  { %442 = vsyncpa [#allocation6], 1 }
 0x2b2   :  { %443 = vsyncpa [#allocation9], 1 }
 0x2b3   :  { %444 = vsyncpa [#allocation4], 1 }

</bundles_post_ra>
